<compile_context>
chip_gen: v5e
topology: v5e:2x2
jax: 0.10.0
libtpu: 0.0.40
codegen_flags: <defaults>
</compile_context>

<pallas_src>
import functools
import math

import jax
import jax.numpy as jnp
from jax.experimental import pallas as pl
from jax.experimental.pallas import tpu as pltpu


def _cdiv(a, b):
    return -(-a // b)


def _round_up(x, m):
    return _cdiv(x, m) * m


# --------------------------------------------------------------------------
# Kernel
# --------------------------------------------------------------------------
def _make_kernel(tanh_in_bf16: bool):
    def kernel(xP_ref, w1_ref, b1_ref, w2_ref, b2_ref, o_ref):
        # xP_ref: (G*msiband, TCOLS)  f32, batch samples on the 128-lane axis
        # w1_ref: (G*hidden, G*msiband)  bf16 block-diag, 0.5*W1 folded in
        # b1_ref: (G*hidden, 1)          f32, 0.5*b1 folded in
        # w2_ref: (G*msiband, G*hidden)  bf16 block-diag, 0.5*W2 folded in
        # b2_ref: (G*msiband, 1)         f32, b2 + 0.5*W2@1 folded in
        # o_ref : (G*msiband, TCOLS)
        xb = xP_ref[...].astype(jnp.bfloat16)          # bf16 MXU operand
        h = jnp.dot(w1_ref[...], xb,
                    preferred_element_type=jnp.float32) + b1_ref[...]
        if tanh_in_bf16:
            # v6e/v7x: bf16-native EUP; result feeds the bf16 matmul directly.
            t = jnp.tanh(h.astype(jnp.bfloat16))
        else:
            # v4/v5: no bf16 VPU/EUP path -> keep the transcendental in f32.
            t = jnp.tanh(h).astype(jnp.bfloat16)
        y = jnp.dot(w2_ref[...], t,
                    preferred_element_type=jnp.float32) + b2_ref[...]
        o_ref[...] = y.astype(o_ref.dtype)
    return kernel


# --------------------------------------------------------------------------
# Parameter / layout preparation (one-time, tiny)
# --------------------------------------------------------------------------
def _default_group(msiband: int) -> int:
    # Smallest G >= 6 with (G*msiband) % 8 == 0: removes sublane padding on
    # the activation DMA tiles while keeping the packed weights small.
    base = 8 // math.gcd(msiband, 8)
    return base * _cdiv(6, base)


def prepare_params(w1, b1, w2, b2, *, group):
    """Fold the sigmoid affine constants and build block-diagonal bf16 weights.

    w1: (hidden, msiband), b1: (hidden,), w2: (msiband, hidden), b2: (msiband,)
    (PyTorch nn.Linear layout).  Weights are tiny and stay resident in VMEM.
    """
    hidden, msiband = w1.shape
    eye = jnp.eye(group, dtype=jnp.float32)
    # sigmoid(z) = 0.5*tanh(0.5*z) + 0.5
    #   => y = (0.5*W2) @ tanh(0.5*W1 x + 0.5*b1) + (b2 + 0.5*W2 @ 1)
    w1f = 0.5 * w1.astype(jnp.float32)
    b1f = 0.5 * b1.astype(jnp.float32)
    w2f = 0.5 * w2.astype(jnp.float32)
    b2f = b2.astype(jnp.float32) + 0.5 * jnp.sum(w2.astype(jnp.float32), axis=1)
    w1_blk = jnp.kron(eye, w1f).astype(jnp.bfloat16)   # (G*hidden, G*msiband)
    w2_blk = jnp.kron(eye, w2f).astype(jnp.bfloat16)   # (G*msiband, G*hidden)
    b1_blk = jnp.tile(b1f, group).reshape(group * hidden, 1)
    b2_blk = jnp.tile(b2f, group).reshape(group * msiband, 1)
    return w1_blk, b1_blk, w2_blk, b2_blk


def _elementwise_bf16_ok():
    # bf16 transcendentals only on v6e / v7x; v2-v5 have no bf16 VPU/EUP path.
    try:
        kind = jax.devices()[0].device_kind.lower()
    except Exception:
        return True
    return not any(t in kind for t in ("v2", "v3", "v4", "v5"))


def _choose_tiling(n_cols_min, *, desired_tile_cols=8192, min_steps=2):
    # Pick steps first, then the tile, so batch padding is bounded by
    # ~128*steps columns instead of a full tile (avoids 60%-dead-column cases).
    steps = max(1, _cdiv(n_cols_min, desired_tile_cols))
    if n_cols_min >= min_steps * 128:
        steps = max(steps, min_steps)   # >=2 steps lets "parallel" use both v7x TCs
    tile = _round_up(_cdiv(n_cols_min, steps), 128)
    return tile, steps * tile


# --------------------------------------------------------------------------
# Packed-layout entry point (no relayout at all; batch already on lanes)
# --------------------------------------------------------------------------
def subbpnn_forward_packed(xP, w1_blk, b1_blk, w2_blk, b2_blk, *, tile_cols,
                           tanh_in_bf16=None):
    """xP: (G*msiband, n_cols) with n_cols % tile_cols == 0.  Returns same shape."""
    rows, n_cols = xP.shape          # rows = G*msiband (multiple of 8 by design)
    gh = w1_blk.shape[0]             # G*hidden
    assert n_cols % tile_cols == 0 and tile_cols % 128 == 0
    if tanh_in_bf16 is None:
        tanh_in_bf16 = _elementwise_bf16_ok()

    itemsize = jnp.dtype(xP.dtype).itemsize
    cost = pl.CostEstimate(
        flops=2 * n_cols * (gh * rows + rows * gh),          # dense block-diag MXU work
        transcendentals=n_cols * gh,
        bytes_accessed=(2 * n_cols * rows * itemsize          # x in + y out (no sublane pad)
                        + (w1_blk.size + w2_blk.size) * 2     # bf16 weights
                        + (b1_blk.size + b2_blk.size) * 4),   # f32 biases
    )

    return pl.pallas_call(
        _make_kernel(tanh_in_bf16),
        out_shape=jax.ShapeDtypeStruct((rows, n_cols), xP.dtype),
        grid_spec=pltpu.PrefetchScalarGridSpec(
            num_scalar_prefetch=0,
            grid=(n_cols // tile_cols,),
            in_specs=[
                pl.BlockSpec((rows, tile_cols), lambda i: (0, i)),   # packed x tile
                pl.BlockSpec((gh, rows), lambda i: (0, 0)),          # W1_blk (resident)
                pl.BlockSpec((gh, 1), lambda i: (0, 0)),             # b1_blk
                pl.BlockSpec((rows, gh), lambda i: (0, 0)),          # W2_blk (resident)
                pl.BlockSpec((rows, 1), lambda i: (0, 0)),           # b2_blk
            ],
            out_specs=pl.BlockSpec((rows, tile_cols), lambda i: (0, i)),
        ),
        compiler_params=pltpu.CompilerParams(
            dimension_semantics=("parallel",)),
        cost_estimate=cost,
    )(xP, w1_blk, b1_blk, w2_blk, b2_blk)


# --------------------------------------------------------------------------
# PyTorch-compatible wrapper: (N, msiband) -> (N, msiband)
# --------------------------------------------------------------------------
def subbpnn_forward(x, w1, b1, w2, b2, *, group=None, desired_tile_cols=8192):
    N, msiband = x.shape
    if group is None:
        group = _default_group(msiband)

    params = prepare_params(w1, b1, w2, b2, group=group)

    n_cols_min = _round_up(_cdiv(N, group), 128)
    tile_cols, n_cols = _choose_tiling(n_cols_min,
                                       desired_tile_cols=desired_tile_cols)
    n_pad = group * n_cols

    # Single pad + transpose in:  (N, m) -> (G*m, n_cols), batch on lanes.
    # (Callers that can keep this layout should use subbpnn_forward_packed.)
    xp = jnp.pad(x, ((0, n_pad - N), (0, 0)))
    xP = (xp.reshape(group, n_cols, msiband)
            .transpose(0, 2, 1)
            .reshape(group * msiband, n_cols))

    yP = subbpnn_forward_packed(xP, *params, tile_cols=tile_cols)

    # Single transpose out; drop batch padding.
    y = (yP.reshape(group, msiband, n_cols)
           .transpose(0, 2, 1)
           .reshape(n_pad, msiband))
    return y[:N]


def init_params(key, msiband=3, hidden=21, dtype=jnp.float32):
    """PyTorch nn.Linear default init: U[-1/sqrt(fan_in), 1/sqrt(fan_in)]."""
    k1, k2, k3, k4 = jax.random.split(key, 4)
    bound1 = 1.0 / jnp.sqrt(msiband)
    bound2 = 1.0 / jnp.sqrt(hidden)
    w1 = jax.random.uniform(k1, (hidden, msiband), dtype, -bound1, bound1)
    b1 = jax.random.uniform(k2, (hidden,), dtype, -bound1, bound1)
    w2 = jax.random.uniform(k3, (msiband, hidden), dtype, -bound2, bound2)
    b2 = jax.random.uniform(k4, (msiband,), dtype, -bound2, bound2)
    return w1, b1, w2, b2


if __name__ == "__main__":
    key = jax.random.PRNGKey(0)
    kx, kp = jax.random.split(key)

    msiband, hidden = 3, 21
    w1, b1, w2, b2 = init_params(kp, msiband=msiband, hidden=hidden)

    # Small tile so even these tiny examples go through the real tiling path.
    fwd = jax.jit(functools.partial(subbpnn_forward, w1=w1, b1=b1, w2=w2, b2=b2,
                                    desired_tile_cols=128))

    # Case 1: N not a multiple of 128*G -> exercises the padding path.
    N = 500
    x = jax.random.normal(kx, (N, msiband), jnp.float32)
    out = jax.block_until_ready(fwd(x))
    ref = jax.nn.sigmoid(x @ w1.T + b1) @ w2.T + b2
    assert out.shape == (N, msiband)
    assert jnp.allclose(out, ref, atol=5e-2, rtol=5e-2), (
        f"mismatch vs reference (max abs err {jnp.max(jnp.abs(out - ref))})")

    # Case 2: larger batch -> multi-step pipelined grid.
    N2 = 2500
    x2 = jax.random.normal(kx, (N2, msiband), jnp.float32)
    out2 = jax.block_until_ready(fwd(x2))
    ref2 = jax.nn.sigmoid(x2 @ w1.T + b1) @ w2.T + b2
    assert out2.shape == (N2, msiband)
    assert jnp.allclose(out2, ref2, atol=5e-2, rtol=5e-2), (
        f"mismatch vs reference (max abs err {jnp.max(jnp.abs(out2 - ref2))})")

    print("KERNEL_OK")
</pallas_src>

<mosaic_0001>
module attributes {stable_mosaic.version = 11 : i64} {
  func.func @kernel(%arg0: i32, %arg1: memref<24x128xf32, #tpu.memory_space<vmem>>, %arg2: memref<168x24xbf16, #tpu.memory_space<vmem>>, %arg3: memref<168x1xf32, #tpu.memory_space<vmem>>, %arg4: memref<24x168xbf16, #tpu.memory_space<vmem>>, %arg5: memref<24x1xf32, #tpu.memory_space<vmem>>, %arg6: memref<24x128xf32, #tpu.memory_space<vmem>>) attributes {dimension_semantics = [#tpu.dimension_semantics<parallel>], iteration_bounds = array<i64: 1>, scalar_prefetch = 0 : i64, scratch_operands = 0 : i64, tpu.core_type = #tpu.core_type<tc>, window_params = [{transform_indices = @transform_0, window_bounds = array<i64: 24, 128>}, {pipeline_mode = #tpu.pipeline_mode<synchronous>, transform_indices = @transform_1, window_bounds = array<i64: 168, 24>}, {pipeline_mode = #tpu.pipeline_mode<synchronous>, transform_indices = @transform_2, window_bounds = array<i64: 168, 1>}, {pipeline_mode = #tpu.pipeline_mode<synchronous>, transform_indices = @transform_3, window_bounds = array<i64: 24, 168>}, {pipeline_mode = #tpu.pipeline_mode<synchronous>, transform_indices = @transform_4, window_bounds = array<i64: 24, 1>}, {transform_indices = @transform_5, window_bounds = array<i64: 24, 128>}]} {
    %c0 = arith.constant 0 : index
    %c0_0 = arith.constant 0 : index
    %0 = vector.load %arg1[%c0, %c0_0] : memref<24x128xf32, #tpu.memory_space<vmem>>, vector<24x128xf32>
    %1 = arith.truncf %0 : vector<24x128xf32> to vector<24x128xbf16>
    %c0_1 = arith.constant 0 : index
    %c0_2 = arith.constant 0 : index
    %2 = vector.load %arg2[%c0_1, %c0_2] : memref<168x24xbf16, #tpu.memory_space<vmem>>, vector<168x24xbf16>
    %cst = arith.constant dense<0.000000e+00> : vector<168x128xf32>
    %3 = tpu.matmul %2, %1, %cst {dimension_numbers = #tpu.dot_dimension_numbers<[1], [0], [0], [1], [0, 0, 1, 1], [], []>} : vector<168x24xbf16>, vector<24x128xbf16>, vector<168x128xf32> -> vector<168x128xf32>
    %c0_3 = arith.constant 0 : index
    %c0_4 = arith.constant 0 : index
    %4 = vector.load %arg3[%c0_3, %c0_4] : memref<168x1xf32, #tpu.memory_space<vmem>>, vector<168x1xf32>
    %5 = vector.broadcast %4 : vector<168x1xf32> to vector<168x128xf32>
    %6 = arith.addf %3, %5 : vector<168x128xf32>
    %7 = arith.truncf %6 : vector<168x128xf32> to vector<168x128xbf16>
    %8 = math.tanh %7 : vector<168x128xbf16>
    %c0_5 = arith.constant 0 : index
    %c0_6 = arith.constant 0 : index
    %9 = vector.load %arg4[%c0_5, %c0_6] : memref<24x168xbf16, #tpu.memory_space<vmem>>, vector<24x168xbf16>
    %cst_7 = arith.constant dense<0.000000e+00> : vector<24x128xf32>
    %10 = tpu.matmul %9, %8, %cst_7 {dimension_numbers = #tpu.dot_dimension_numbers<[1], [0], [0], [1], [0, 0, 1, 1], [], []>} : vector<24x168xbf16>, vector<168x128xbf16>, vector<24x128xf32> -> vector<24x128xf32>
    %c0_8 = arith.constant 0 : index
    %c0_9 = arith.constant 0 : index
    %11 = vector.load %arg5[%c0_8, %c0_9] : memref<24x1xf32, #tpu.memory_space<vmem>>, vector<24x1xf32>
    %12 = vector.broadcast %11 : vector<24x1xf32> to vector<24x128xf32>
    %13 = arith.addf %10, %12 : vector<24x128xf32>
    %c0_10 = arith.constant 0 : index
    %c0_11 = arith.constant 0 : index
    %14 = vector.load %arg6[%c0_10, %c0_11] : memref<24x128xf32, #tpu.memory_space<vmem>>, vector<24x128xf32>
    tpu.vector_store %arg6[%c0_10, %c0_11], %13 {strides = array<i32>} : memref<24x128xf32, #tpu.memory_space<vmem>>, vector<24x128xf32>,
    return
  }
  func.func @transform_0(%arg0: i32) -> (i32, i32) {
    %c0_i32 = arith.constant 0 : i32
    %c0_i32_0 = arith.constant 0 : i32
    return %c0_i32, %arg0 : i32, i32
  }
  func.func @transform_1(%arg0: i32) -> (i32, i32) {
    %c0_i32 = arith.constant 0 : i32
    %c0_i32_0 = arith.constant 0 : i32
    %c0_i32_1 = arith.constant 0 : i32
    return %c0_i32, %c0_i32_0 : i32, i32
  }
  func.func @transform_2(%arg0: i32) -> (i32, i32) {
    %c0_i32 = arith.constant 0 : i32
    %c0_i32_0 = arith.constant 0 : i32
    %c0_i32_1 = arith.constant 0 : i32
    return %c0_i32, %c0_i32_0 : i32, i32
  }
  func.func @transform_3(%arg0: i32) -> (i32, i32) {
    %c0_i32 = arith.constant 0 : i32
    %c0_i32_0 = arith.constant 0 : i32
    %c0_i32_1 = arith.constant 0 : i32
    return %c0_i32, %c0_i32_0 : i32, i32
  }
  func.func @transform_4(%arg0: i32) -> (i32, i32) {
    %c0_i32 = arith.constant 0 : i32
    %c0_i32_0 = arith.constant 0 : i32
    %c0_i32_1 = arith.constant 0 : i32
    return %c0_i32, %c0_i32_0 : i32, i32
  }
  func.func @transform_5(%arg0: i32) -> (i32, i32) {
    %c0_i32 = arith.constant 0 : i32
    %c0_i32_0 = arith.constant 0 : i32
    return %c0_i32, %arg0 : i32, i32
  }
}

</mosaic_0001>

<bundles_post_ra>
// kernel: tile.1
= control target key start
LH: loop header
LB: loop body
LE: loop exit
PB: predicated region body
PF: predicated region fallthrough
CT: control target
= control target key end

     0   :  { %vm3_vm0 = vcmask 7168   ;;  %s22_s10 = smov 126   ;;  %s45_s0 = inlined_call_operand.vmem [shape: f32[8,3], index: 0, kind: input, shape index: {}]   ;;  %s46_s1 = inlined_call_operand.vmem [shape: f32[24,1], index: 1, kind: output, shape index: {}]  }
   0x1   :  { %v5_v0 = vld [vmem:[%s45_s0] sm:$0xff]   ;;  %s21_s0 = smov 127  }
   0x2   :  { %6 = vrot.lane.b32.xlu0 %v5_v0, %s21_s0  ;;  %4 = vst.msk [vmem:[%s46_s1] ss:$3 sm:$0xff] %vm3_vm0, %v5_v0  }
   0xa   :  { %12 = vrot.lane.b32.xlu0 %v5_v0, %s22_s10 }
  0x74   :  { %v7_v1 = vpop.permute.xlu0 %6  }
  0x75   :  { %17 = vst.msk [vmem:[%s46_s1 + $0x1] ss:$3 sm:$0xff] %vm3_vm0, %v7_v1  }
  0x7c   :  { %v13_v2 = vpop.permute.xlu0 %12  }
  0x7d   :  { %18 = vst.msk [vmem:[%s46_s1 + $0x2] ss:$3 sm:$0xff] %vm3_vm0, %v13_v2  }

// kernel: tile.16
= control target key start
LH: loop header
LB: loop body
LE: loop exit
PB: predicated region body
PF: predicated region fallthrough
CT: control target
= control target key end

     0   :  { %s22_s0 = inlined_call_operand.vmem [shape: f32[3], index: 0, kind: input, shape index: {}]   ;;  %s23_s1 = inlined_call_operand.vmem [shape: f32[8,3], index: 1, kind: output, shape index: {}]  }
   0x1   :  { %v4_v0 = vld [vmem:[%s22_s0] ss:$0 sm:$0xff] }
   0x2   :  { %5 = vst [vmem:[%s23_s1] sm:$0xff] %v4_v0 }

// kernel: tile.11
= control target key start
LH: loop header
LB: loop body
LE: loop exit
PB: predicated region body
PF: predicated region fallthrough
CT: control target
= control target key end

     0   :  { %s22_s0 = inlined_call_operand.vmem [shape: f32[21], index: 0, kind: input, shape index: {}]   ;;  %s23_s1 = inlined_call_operand.vmem [shape: f32[8,21], index: 1, kind: output, shape index: {}]  }
   0x1   :  { %v4_v0 = vld [vmem:[%s22_s0] ss:$0 sm:$0xff] }
   0x2   :  { %5 = vst [vmem:[%s23_s1] sm:$0xff] %v4_v0 }

// kernel: tile.0
= control target key start
LH: loop header
LB: loop body
LE: loop exit
PB: predicated region body
PF: predicated region fallthrough
CT: control target
= control target key end

     0   :  { %s294_s10 = smov 125   ;;  %s295_s11 = smov 127   ;;  %vm3_vm0 = vcmask 7168   ;;  %s598_s0 = inlined_call_operand.vmem [shape: f32[8,21], index: 0, kind: input, shape index: {}]   ;;  %s599_s1 = inlined_call_operand.vmem [shape: f32[168,1], index: 1, kind: output, shape index: {}]  }
   0x1   :  { %v27_v0 = vld.sshfl [vmem:[%s598_s0] sm:$0xff pattern:$0x14725036]   ;;  %s296_s12 = smov 123   ;;  %s297_s13 = smov 124  }
   0x2   :  { %v5_v1 = vld.sshfl [vmem:[%s598_s0] sm:$0xff pattern:$0x61472503]   ;;  %28 = vrot.lane.b32.xlu1 %v27_v0, %s294_s10  ;;  %48 = vrot.lane.b32.xlu2 %v27_v0, %s296_s12  ;;  %s298_s14 = smov 126   ;;  %s299_s15 = smov 122  }
   0x3   :  { %6 = vrot.lane.b32.xlu0 %v5_v1, %s295_s11  ;;  %s300_s16 = smov 120   ;;  %s301_s17 = smov 121   ;;  %v107_v2 = vld.sshfl [vmem:[%s598_s0] sm:$0xff pattern:$0x47250361]  }
   0x4   :  { %s302_s18 = smov 119   ;;  %s303_s21 = smov 117   ;;  %v119_v3 = vld.sshfl [vmem:[%s598_s0] sm:$0xff pattern:$0x72503614]  }
   0x5   :  { %s304_s22 = smov 118   ;;  %s305_s25 = smov 116   ;;  %v141_v4 = vld.sshfl [vmem:[%s598_s0] sm:$0xff pattern:$0x25036147]  }
   0x6   :  { %s306_s28 = smov 114   ;;  %s307_s29 = smov 115   ;;  %v2_v25 = vld [vmem:[%s598_s0] sm:$0xff]  }
   0x7   :  { %s308_s30 = smov 113   ;;  %s309_s2 = smov 111   ;;  %4 = vst.msk [vmem:[%s599_s1] ss:$21 sm:$0xff] %vm3_vm0, %v2_v25  }
   0x8   :  { %s310_s3 = smov 112   ;;  %s311_s4 = smov 110  }
   0x9   :  { %s312_s5 = smov 108   ;;  %s313_s6 = smov 109  }
   0xa   :  { %38 = vrot.lane.b32.xlu1 %v27_v0, %s297_s13  ;;  %58 = vrot.lane.b32.xlu2 %v27_v0, %s299_s15 }
   0xb   :  { %18 = vrot.lane.b32.xlu0 %v27_v0, %s298_s14 }
  0x12   :  { %78 = vrot.lane.b32.xlu1 %v27_v0, %s300_s16  ;;  %88 = vrot.lane.b32.xlu2 %v27_v0, %s302_s18 }
  0x13   :  { %68 = vrot.lane.b32.xlu0 %v27_v0, %s301_s17 }
  0x1a   :  { %108 = vrot.lane.b32.xlu1 %v107_v2, %s303_s21  ;;  %120 = vrot.lane.b32.xlu2 %v119_v3, %s305_s25 }
  0x1b   :  { %98 = vrot.lane.b32.xlu0 %v27_v0, %s304_s22 }
  0x22   :  { %142 = vrot.lane.b32.xlu1 %v141_v4, %s306_s28  ;;  %152 = vrot.lane.b32.xlu2 %v141_v4, %s308_s30 }
  0x23   :  { %132 = vrot.lane.b32.xlu0 %v141_v4, %s307_s29 }
  0x2a   :  { %172 = vrot.lane.b32.xlu1 %v141_v4, %s309_s2  ;;  %182 = vrot.lane.b32.xlu2 %v141_v4, %s311_s4 }
  0x2b   :  { %162 = vrot.lane.b32.xlu0 %v141_v4, %s310_s3 }
  0x32   :  { %202 = vrot.lane.b32.xlu1 %v141_v4, %s312_s5 }
  0x33   :  { %192 = vrot.lane.b32.xlu0 %v141_v4, %s313_s6 }
  0x5c   :  { %v49_v5 = vpop.permute.xlu2 %48  }
  0x5d   :  { %224 = vst.msk [vmem:[%s599_s1 + $0x83] ss:$-63 sm:$0x7] %vm3_vm0, %v49_v5  }
  0x5e   :  { %225 = vst.msk [vmem:[%s599_s1 + $0x12b] ss:$-63 sm:$0x18] %vm3_vm0, %v49_v5  }
  0x5f   :  { %226 = vst.msk [vmem:[%s599_s1 + $0x1d3] ss:$-63 sm:$0xe0] %vm3_vm0, %v49_v5  }
  0x64   :  { %v59_v6 = vpop.permute.xlu2 %58  }
  0x65   :  { %227 = vst.msk [vmem:[%s599_s1 + $0x84] ss:$-63 sm:$0x7] %vm3_vm0, %v59_v6  }
  0x66   :  { %228 = vst.msk [vmem:[%s599_s1 + $0x12c] ss:$-63 sm:$0x18] %vm3_vm0, %v59_v6  }
  0x67   :  { %229 = vst.msk [vmem:[%s599_s1 + $0x1d4] ss:$-63 sm:$0xe0] %vm3_vm0, %v59_v6  }
  0x6c   :  { %v89_v7 = vpop.permute.xlu2 %88  }
  0x6d   :  { %236 = vst.msk [vmem:[%s599_s1 + $0x87] ss:$-63 sm:$0x7] %vm3_vm0, %v89_v7  }
  0x6e   :  { %237 = vst.msk [vmem:[%s599_s1 + $0x12f] ss:$-63 sm:$0x18] %vm3_vm0, %v89_v7  }
  0x6f   :  { %238 = vst.msk [vmem:[%s599_s1 + $0x1d7] ss:$-63 sm:$0xe0] %vm3_vm0, %v89_v7  }
  0x74   :  { %v29_v8 = vpop.permute.xlu1 %28   ;;  %v121_v10 = vpop.permute.xlu2 %120  }
  0x75   :  { %v7_v9 = vpop.permute.xlu0 %6   ;;  %218 = vst.msk [vmem:[%s599_s1 + $0x81] ss:$-63 sm:$0x7] %vm3_vm0, %v29_v8  }
  0x76   :  { %219 = vst.msk [vmem:[%s599_s1 + $0x129] ss:$-63 sm:$0x18] %vm3_vm0, %v29_v8  }
  0x77   :  { %220 = vst.msk [vmem:[%s599_s1 + $0x1d1] ss:$-63 sm:$0xe0] %vm3_vm0, %v29_v8  }
  0x78   :  { %211 = vst.msk [vmem:[%s599_s1 + $0x40] ss:$-63 sm:$0x3] %vm3_vm0, %v7_v9  }
  0x79   :  { %212 = vst.msk [vmem:[%s599_s1 + $0xe8] ss:$-63 sm:$0xc] %vm3_vm0, %v7_v9  }
  0x7a   :  { %213 = vst.msk [vmem:[%s599_s1 + $0x190] ss:$-63 sm:$0x70] %vm3_vm0, %v7_v9  }
  0x7b   :  { %214 = vst.msk [vmem:[%s599_s1 + $0x78] sm:$0x80] %vm3_vm0, %v7_v9  }
  0x7c   :  { %v39_v11 = vpop.permute.xlu1 %38   ;;  %246 = vst.msk [vmem:[%s599_s1 + $0x60] ss:$-63 sm:$0x3] %vm3_vm0, %v121_v10   ;;  %v153_v13 = vpop.permute.xlu2 %152  }
  0x7d   :  { %v19_v12 = vpop.permute.xlu0 %18   ;;  %221 = vst.msk [vmem:[%s599_s1 + $0x82] ss:$-63 sm:$0x7] %vm3_vm0, %v39_v11  }
  0x7e   :  { %222 = vst.msk [vmem:[%s599_s1 + $0x12a] ss:$-63 sm:$0x18] %vm3_vm0, %v39_v11  }
  0x7f   :  { %223 = vst.msk [vmem:[%s599_s1 + $0x1d2] ss:$-63 sm:$0xe0] %vm3_vm0, %v39_v11  }
  0x80   :  { %215 = vst.msk [vmem:[%s599_s1 + $0x80] ss:$-63 sm:$0x7] %vm3_vm0, %v19_v12  }
  0x81   :  { %216 = vst.msk [vmem:[%s599_s1 + $0x128] ss:$-63 sm:$0x18] %vm3_vm0, %v19_v12  }
  0x82   :  { %217 = vst.msk [vmem:[%s599_s1 + $0x1d0] ss:$-63 sm:$0xe0] %vm3_vm0, %v19_v12  }
  0x83   :  { %247 = vst.msk [vmem:[%s599_s1 + $0x108] ss:$-63 sm:$0x1c] %vm3_vm0, %v121_v10  }
  0x84   :  { %v79_v14 = vpop.permute.xlu1 %78   ;;  %248 = vst.msk [vmem:[%s599_s1 + $0x1b0] ss:$-63 sm:$0x60] %vm3_vm0, %v121_v10   ;;  %v183_v16 = vpop.permute.xlu2 %182  }
  0x85   :  { %v69_v15 = vpop.permute.xlu0 %68   ;;  %233 = vst.msk [vmem:[%s599_s1 + $0x86] ss:$-63 sm:$0x7] %vm3_vm0, %v79_v14  }
  0x86   :  { %234 = vst.msk [vmem:[%s599_s1 + $0x12e] ss:$-63 sm:$0x18] %vm3_vm0, %v79_v14  }
  0x87   :  { %235 = vst.msk [vmem:[%s599_s1 + $0x1d6] ss:$-63 sm:$0xe0] %vm3_vm0, %v79_v14  }
  0x88   :  { %230 = vst.msk [vmem:[%s599_s1 + $0x85] ss:$-63 sm:$0x7] %vm3_vm0, %v69_v15  }
  0x89   :  { %231 = vst.msk [vmem:[%s599_s1 + $0x12d] ss:$-63 sm:$0x18] %vm3_vm0, %v69_v15  }
  0x8a   :  { %232 = vst.msk [vmem:[%s599_s1 + $0x1d5] ss:$-63 sm:$0xe0] %vm3_vm0, %v69_v15  }
  0x8b   :  { %249 = vst.msk [vmem:[%s599_s1 + $0x98] sm:$0x80] %vm3_vm0, %v121_v10  }
  0x8c   :  { %v109_v17 = vpop.permute.xlu1 %108   ;;  %256 = vst.msk [vmem:[%s599_s1 + $0xa2] ss:$-63 sm:$0x7] %vm3_vm0, %v153_v13  }
  0x8d   :  { %v99_v18 = vpop.permute.xlu0 %98   ;;  %242 = vst.msk [vmem:[%s599_s1 + $0x20] ss:$105 sm:$0x3] %vm3_vm0, %v109_v17  }
  0x8e   :  { %243 = vst.msk [vmem:[%s599_s1 + $0xc8] ss:$-63 sm:$0xc] %vm3_vm0, %v109_v17  }
  0x8f   :  { %244 = vst.msk [vmem:[%s599_s1 + $0x170] ss:$-63 sm:$0x30] %vm3_vm0, %v109_v17  }
  0x90   :  { %245 = vst.msk [vmem:[%s599_s1 + $0x218] ss:$-63 sm:$0xc0] %vm3_vm0, %v109_v17  }
  0x91   :  { %239 = vst.msk [vmem:[%s599_s1 + $0x88] ss:$-63 sm:$0x7] %vm3_vm0, %v99_v18  }
  0x92   :  { %240 = vst.msk [vmem:[%s599_s1 + $0x130] ss:$-63 sm:$0x18] %vm3_vm0, %v99_v18  }
  0x93   :  { %241 = vst.msk [vmem:[%s599_s1 + $0x1d8] ss:$-63 sm:$0xe0] %vm3_vm0, %v99_v18  }
  0x94   :  { %v143_v19 = vpop.permute.xlu1 %142   ;;  %257 = vst.msk [vmem:[%s599_s1 + $0x14a] ss:$-63 sm:$0x38] %vm3_vm0, %v153_v13  }
  0x95   :  { %v133_v20 = vpop.permute.xlu0 %132   ;;  %253 = vst.msk [vmem:[%s599_s1 + $0xa1] ss:$-63 sm:$0x7] %vm3_vm0, %v143_v19  }
  0x96   :  { %254 = vst.msk [vmem:[%s599_s1 + $0x149] ss:$-63 sm:$0x38] %vm3_vm0, %v143_v19  }
  0x97   :  { %255 = vst.msk [vmem:[%s599_s1 + $0x1f1] ss:$-63 sm:$0xc0] %vm3_vm0, %v143_v19  }
  0x98   :  { %250 = vst.msk [vmem:[%s599_s1 + $0xa0] ss:$-63 sm:$0x7] %vm3_vm0, %v133_v20  }
  0x99   :  { %251 = vst.msk [vmem:[%s599_s1 + $0x148] ss:$-63 sm:$0x38] %vm3_vm0, %v133_v20  }
  0x9a   :  { %252 = vst.msk [vmem:[%s599_s1 + $0x1f0] ss:$-63 sm:$0xc0] %vm3_vm0, %v133_v20  }
  0x9b   :  { %258 = vst.msk [vmem:[%s599_s1 + $0x1f2] ss:$-63 sm:$0xc0] %vm3_vm0, %v153_v13  }
  0x9c   :  { %v173_v21 = vpop.permute.xlu1 %172   ;;  %265 = vst.msk [vmem:[%s599_s1 + $0xa5] ss:$-63 sm:$0x7] %vm3_vm0, %v183_v16  }
  0x9d   :  { %v163_v22 = vpop.permute.xlu0 %162   ;;  %262 = vst.msk [vmem:[%s599_s1 + $0xa4] ss:$-63 sm:$0x7] %vm3_vm0, %v173_v21  }
  0x9e   :  { %263 = vst.msk [vmem:[%s599_s1 + $0x14c] ss:$-63 sm:$0x38] %vm3_vm0, %v173_v21  }
  0x9f   :  { %264 = vst.msk [vmem:[%s599_s1 + $0x1f4] ss:$-63 sm:$0xc0] %vm3_vm0, %v173_v21  }
  0xa0   :  { %259 = vst.msk [vmem:[%s599_s1 + $0xa3] ss:$-63 sm:$0x7] %vm3_vm0, %v163_v22  }
  0xa1   :  { %260 = vst.msk [vmem:[%s599_s1 + $0x14b] ss:$-63 sm:$0x38] %vm3_vm0, %v163_v22  }
  0xa2   :  { %261 = vst.msk [vmem:[%s599_s1 + $0x1f3] ss:$-63 sm:$0xc0] %vm3_vm0, %v163_v22  }
  0xa3   :  { %266 = vst.msk [vmem:[%s599_s1 + $0x14d] ss:$-63 sm:$0x38] %vm3_vm0, %v183_v16  }
  0xa4   :  { %267 = vst.msk [vmem:[%s599_s1 + $0x1f5] ss:$-63 sm:$0xc0] %vm3_vm0, %v183_v16   ;;  %v203_v23 = vpop.permute.xlu1 %202  }
  0xa5   :  { %v193_v24 = vpop.permute.xlu0 %192   ;;  %271 = vst.msk [vmem:[%s599_s1 + $0xa7] ss:$-63 sm:$0x7] %vm3_vm0, %v203_v23  }
  0xa6   :  { %272 = vst.msk [vmem:[%s599_s1 + $0x14f] ss:$-63 sm:$0x38] %vm3_vm0, %v203_v23  }
  0xa7   :  { %273 = vst.msk [vmem:[%s599_s1 + $0x1f7] ss:$-63 sm:$0xc0] %vm3_vm0, %v203_v23  }
  0xa8   :  { %268 = vst.msk [vmem:[%s599_s1 + $0xa6] ss:$-63 sm:$0x7] %vm3_vm0, %v193_v24  }
  0xa9   :  { %269 = vst.msk [vmem:[%s599_s1 + $0x14e] ss:$-63 sm:$0x38] %vm3_vm0, %v193_v24  }
  0xaa   :  { %270 = vst.msk [vmem:[%s599_s1 + $0x1f6] ss:$-63 sm:$0xc0] %vm3_vm0, %v193_v24  }

// kernel: subbpnn_forward.1
= control target key start
LH: loop header
LB: loop body
LE: loop exit
PB: predicated region body
PF: predicated region fallthrough
CT: control target
= control target key end

     0   :  { %v603_v0 = vmov 0   ;;  %vm260_vm0 = vcmask 1043456   ;;  %vm226_vm1 = vcmask 195584   ;;  %vm427_vm2 = vcmask 326656   ;;  %s818_s2 = inlined_call_operand.vmem [shape: f32[168,1], index: 2, kind: input, shape index: {}]   ;;  %s819_s0 = inlined_call_operand.vmem [shape: f32[24,128], index: 0, kind: input, shape index: {}]   ;;  %s820_s1 = inlined_call_operand.vmem [shape: bf16[168,24], index: 1, kind: input, shape index: {}]   ;;  %s821_s4 = inlined_call_operand.vmem [shape: f32[24,1], index: 4, kind: input, shape index: {}]   ;;  %s822_s3 = inlined_call_operand.vmem [shape: bf16[24,168], index: 3, kind: input, shape index: {}]   ;;  %s823_s5 = inlined_call_operand.vmem [shape: f32[24,128], index: 5, kind: output, shape index: {}]  }
   0x1   :  { %559 = vset.pattern.permute.xlu1 %v603_v0  ;;  %558 = vset.pattern.permute.xlu0 %v603_v0  ;;  %v61_v1 = vld [vmem:[%s818_s2 + $0x70] sm:$0xff]  ;;  %v59_v2 = vld [vmem:[%s818_s2 + $0x60] sm:$0xff]  ;;  %v22_v7 = vld [vmem:[%s819_s0 + $0x8] sm:$0xff] }
   0x2   :  { %v23_v3 = vld [vmem:[%s819_s0 + $0x10] sm:$0xff]  ;;  %140 = vperm.xlu0 %558, %v61_v1   ;;  %130 = vperm.xlu1 %559, %v59_v2   ;;  %v21_v6 = vld [vmem:[%s819_s0] sm:$0xff]  ;;  %v62_v10 = vld [vmem:[%s818_s2 + $0x78] sm:$0xff] }
   0x3   :  { %v25_v4 = vpack.c.bf16 %v23_v3, %v23_v3  ;;  %v57_v5 = vld [vmem:[%s818_s2 + $0x50] sm:$0xff]  ;;  %560 = vset.pattern.permute.xlu2 %v603_v0  ;;  %v24_v9 = vpack.c.bf16 %v22_v7, %v21_v6  ;;  %v60_v11 = vld [vmem:[%s818_s2 + $0x68] sm:$0xff]  ;;  %v541_v12 = vld [vmem:[%s820_s1] sm:$0xff] }
   0x4   :  { %120 = vperm.xlu2 %560, %v57_v5   ;;  %v547_v13 = vld [vmem:[%s820_s1 + $0x30] sm:$0xff]  ;;  %v58_v14 = vld [vmem:[%s818_s2 + $0x58] sm:$0xff]  ;;  %v546_v15 = vld [vmem:[%s820_s1 + $0x28] sm:$0xff] }
   0x5   :  { %v262_v8 = vsel %vm260_vm0, %v25_v4, 0  ;;  %v56_v16 = vld [vmem:[%s818_s2 + $0x48] sm:$0xff]  ;;  %v55_v17 = vld [vmem:[%s818_s2 + $0x40] sm:$0xff]  ;;  %v54_v19 = vld [vmem:[%s818_s2 + $0x38] sm:$0xff] }
   0x6   :  { %270 = vmatpush.bf16.msra.mxu0 %v262_v8  ;;  %554 = vmatpush.bf16.msra.mxu3 %v262_v8  ;;  %v67_v18 = vld [vmem:[%s818_s2 + $0xa0] sm:$0xff]  ;;  %v53_v20 = vld [vmem:[%s818_s2 + $0x30] sm:$0xff]  ;;  %v542_v21 = vld [vmem:[%s820_s1 + $0x8] sm:$0xff] }
   0x7   :  { %553 = vmatpush.bf16.msra.mxu2 %v262_v8  ;;  %v548_v22 = vld [vmem:[%s820_s1 + $0x38] sm:$0xff]  ;;  %v65_v23 = vld [vmem:[%s818_s2 + $0x90] sm:$0xff]  ;;  %v51_v25 = vld [vmem:[%s818_s2 + $0x20] sm:$0xff] }
   0x8   :  { %v66_v24 = vld [vmem:[%s818_s2 + $0x98] sm:$0xff]  ;;  %v52_v26 = vld [vmem:[%s818_s2 + $0x28] sm:$0xff]  ;;  %v63_v27 = vld [vmem:[%s818_s2 + $0x80] sm:$0xff] }
   0x9   :  { %v64_v28 = vld [vmem:[%s818_s2 + $0x88] sm:$0xff]  ;;  %v543_v29 = vld [vmem:[%s820_s1 + $0x10] sm:$0xff]  ;;  %v549_v30 = vld [vmem:[%s820_s1 + $0x40] sm:$0xff] }
   0xa   :  { %271 = vmatpush.bf16.msra.mxu0 %v24_v9  ;;  %556 = vmatpush.bf16.msra.mxu3 %v24_v9  ;;  %v49_v31 = vld [vmem:[%s818_s2 + $0x10] sm:$0xff]  ;;  %v50_v32 = vld [vmem:[%s818_s2 + $0x18] sm:$0xff]  ;;  %v47_v33 = vld [vmem:[%s818_s2] sm:$0xff] }
   0xb   :  { %145 = vperm.xlu0 %558, %v62_v10   ;;  %135 = vperm.xlu1 %559, %v60_v11   ;;  %v48_v34 = vld [vmem:[%s818_s2 + $0x8] sm:$0xff]  ;;  %v394_v35 = vld [vmem:[%s821_s4] sm:$0xff]  ;;  %v544_v37 = vld [vmem:[%s820_s1 + $0x18] sm:$0xff] }
   0xc   :  { %555 = vmatpush.bf16.msra.mxu2 %v24_v9  ;;  %125 = vperm.xlu2 %560, %v58_v14   ;;  %v395_v36 = vld [vmem:[%s821_s4 + $0x8] sm:$0xff]  ;;  %v396_v39 = vld [vmem:[%s821_s4 + $0x10] sm:$0xff]  ;;  %v545_v42 = vld [vmem:[%s820_s1 + $0x20] sm:$0xff] }
   0xd   :  { %520 = vmatmul.msk.bf16.vlgmr.msra.gmra.mxu0 %vm226_vm1, %v541_v12  ;;  %526 = vmatmul.msk.bf16.vlgmr.msra.gmra.mxu3 %vm226_vm1, %v547_v13  ;;  %v550_v38 = vld [vmem:[%s820_s1 + $0x48] sm:$0xff]  ;;  %v46_v40 = vld [vmem:[%s820_s1 + $0x50] sm:$0xf] }
   0xe   :  { %v214_v41 = vunpack.c.l.b16 %v46_v40 }
   0xf   :  { %525 = vmatmul.msk.bf16.vlgmr.msra.gmra.mxu2 %vm226_vm1, %v546_v15 }
  0x10   :  { %v225_v43 = vpack.c.b16 %v214_v41, %v214_v41 }
  0x13   :  { %115 = vperm.xlu1 %559, %v56_v16   ;;  %110 = vperm.xlu0 %558, %v55_v17  }
  0x14   :  { %170 = vperm.xlu2 %560, %v67_v18  }
  0x1b   :  { %105 = vperm.xlu1 %559, %v54_v19   ;;  %100 = vperm.xlu0 %558, %v53_v20  }
  0x1c   :  { %160 = vperm.xlu2 %560, %v65_v23  }
  0x1d   :  { %521 = vmatmul.msk.bf16.gmra.mxu0 %vm226_vm1, %v542_v21  ;;  %527 = vmatmul.msk.bf16.gmra.mxu3 %vm226_vm1, %v548_v22 }
  0x23   :  { %165 = vperm.xlu0 %558, %v66_v24   ;;  %90 = vperm.xlu1 %559, %v51_v25  }
  0x24   :  { %95 = vperm.xlu2 %560, %v52_v26  }
  0x2b   :  { %150 = vperm.xlu0 %558, %v63_v27   ;;  %155 = vperm.xlu1 %559, %v64_v28  }
  0x2c   :  { %80 = vperm.xlu2 %560, %v49_v31  }
  0x2d   :  { %522 = vmatmul.msk.bf16.gmra.mxu0 %vm226_vm1, %v543_v29  ;;  %528 = vmatmul.msk.bf16.gmra.mxu3 %vm226_vm1, %v549_v30 }
  0x33   :  { %85 = vperm.xlu0 %558, %v50_v32   ;;  %70 = vperm.xlu1 %559, %v47_v33  }
  0x34   :  { %75 = vperm.xlu2 %560, %v48_v34  }
  0x3b   :  { %399 = vperm.xlu0 %558, %v394_v35   ;;  %404 = vperm.xlu1 %559, %v395_v36  }
  0x3c   :  { %409 = vperm.xlu2 %560, %v396_v39  }
  0x3d   :  { %523 = vmatmul.msk.bf16.gmra.mxu0 %vm226_vm1, %v544_v37  ;;  %529 = vmatmul.msk.bf16.gmra.mxu3 %vm226_vm1, %v550_v38 }
  0x4d   :  { %524 = vmatmul.msk.bf16.gmra.mxu0 %vm226_vm1, %v545_v42  ;;  %530 = vmatmul.msk.bf16.gmra.mxu3 %vm226_vm1, %v225_v43 }
  0x5e   :  { %v121_v44 = vpop.permute.xlu2 %120 }
  0x66   :  { %v126_v45 = vpop.permute.xlu2 %125 }
  0x6e   :  { %v760_v47 = vpop.permute.xlu2 %170 }
  0x74   :  { %v131_v46 = vpop.permute.xlu1 %130  ;;  %v141_v57 = vpop.permute.xlu0 %140 }
  0x76   :  { %v762_v49 = vpop.permute.xlu2 %160 }
  0x7d   :  { %v136_v48 = vpop.permute.xlu1 %135  ;;  %v146_v0 = vpop.permute.xlu0 %145 }
  0x7e   :  { %v768_v53 = vpop.permute.xlu2 %95 }
  0x85   :  { %v764_v50 = vpop.permute.xlu1 %115  ;;  %v111_v17 = vpop.permute.xlu0 %110 }
  0x86   :  { %v772_v59 = vpop.permute.xlu2 %80 }
  0x8a   :  { %v273_v51 = vpop.f32.mrf.mxu0 }
  0x8d   :  { %v766_v52 = vpop.permute.xlu1 %105  ;;  %v101_v28 = vpop.permute.xlu0 %100 }
  0x8e   :  { %v76_v2 = vpop.permute.xlu2 %75 }
  0x90   :  { %v303_v54 = vpop.f32.mrf.mxu3 }
  0x91   :  { %v304_v8 = vadd.f32 %v303_v54, %v131_v46 }
  0x92   :  { %v275_v55 = vpop.f32.mrf.mxu0  ;;  %v298_v61 = vpop.f32.mrf.mxu2 }
  0x93   :  { %v276_v5 = vadd.f32 %v275_v55, %v76_v2  ;;  %v299_v11 = vadd.f32 %v298_v61, %v121_v44 }
  0x95   :  { %v770_v56 = vpop.permute.xlu1 %90  ;;  %v166_v40 = vpop.permute.xlu0 %165 }
  0x98   :  { %v305_v58 = vpop.f32.mrf.mxu3 }
  0x99   :  { %v306_v6 = vadd.f32 %v305_v58, %v136_v48 }
  0x9a   :  { %v774_v60 = vpop.f32.mrf.mxu0  ;;  %v300_v4 = vpop.f32.mrf.mxu2 }
  0x9b   :  { %v301_v12 = vadd.f32 %v300_v4, %v126_v45  ;;  %v333_v15 = vpack.c.bf16 %v306_v6, %v304_v8 }
  0x9d   :  { %v156_v62 = vpop.permute.xlu1 %155  ;;  %v332_v19 = vpack.c.bf16 %v301_v12, %v299_v11  ;;  %v350_v22 = vunpack.c.l.bf16 %v333_v15  ;;  %v351_v23 = vunpack.c.h.bf16 %v333_v15  ;;  %v151_v44 = vpop.permute.xlu0 %150 }
  0x9f   :  { %v348_v25 = vunpack.c.l.bf16 %v332_v19  ;;  %v349_v26 = vunpack.c.h.bf16 %v332_v19 }
  0xa0   :  { %v308_v63 = vpop.f32.mrf.mxu3 }
  0xa1   :  { %v309_v13 = vadd.f32 %v308_v63, %v141_v57 }
  0xa2   :  { %v776_v1 = vpop.f32.mrf.mxu0 }
  0xa5   :  { %v71_v3 = vpop.permute.xlu1 %70  ;;  %v86_v4 = vpop.permute.xlu0 %85 }
  0xa6   :  { %v274_v7 = vadd.f32 %v273_v51, %v71_v3  ;;  %v281_v12 = vadd.f32 %v776_v1, %v86_v4 }
  0xa8   :  { %v778_v9 = vpack.c.bf16 %v276_v5, %v274_v7  ;;  %v310_v10 = vpop.f32.mrf.mxu3 }
  0xa9   :  { %v311_v14 = vadd.f32 %v310_v10, %v146_v0 }
  0xaa   :  { %v283_v16 = vpop.f32.mrf.mxu0 }
  0xab   :  { %v334_v18 = vpack.c.bf16 %v311_v14, %v309_v13 }
  0xad   :  { %v352_v20 = vunpack.c.l.bf16 %v334_v18  ;;  %v353_v21 = vunpack.c.h.bf16 %v334_v18 }
  0xaf   :  { %561 = vtanh.f32 %v352_v20 }
  0xb0   :  { %v313_v24 = vpop.f32.mrf.mxu3  ;;  %563 = vtanh.f32 %v353_v21 }
  0xb1   :  { %565 = vtanh.f32 %v350_v22  ;;  %v314_v63 = vadd.f32 %v313_v24, %v151_v44 }
  0xb2   :  { %v285_v27 = vpop.f32.mrf.mxu0  ;;  %567 = vtanh.f32 %v351_v23 }
  0xb3   :  { %569 = vtanh.f32 %v348_v25  ;;  %v286_v0 = vadd.f32 %v285_v27, %v768_v53 }
  0xb4   :  { %571 = vtanh.f32 %v349_v26 }
  0xb5   :  { %v562_v29 = vpop.eup %561 }
  0xb6   :  { %v564_v30 = vpop.eup %563 }
  0xb7   :  { %v566_v31 = vpop.eup %565  ;;  %v387_v33 = vpack.c.bf16 %v564_v30, %v562_v29 }
  0xb8   :  { %v315_v32 = vpop.f32.mrf.mxu3  ;;  %v568_v34 = vpop.eup %567 }
  0xb9   :  { %v570_v35 = vpop.eup %569  ;;  %437 = vmatpush.bf16.msra.mxu1 %v387_v33  ;;  %v386_v38 = vpack.c.bf16 %v568_v34, %v566_v31  ;;  %v316_v57 = vadd.f32 %v315_v32, %v156_v62  ;;  %v338_v31 = vunpack.c.l.bf16 %v778_v9  ;;  %v339_v34 = vunpack.c.h.bf16 %v778_v9 }
  0xba   :  { %v288_v36 = vpop.f32.mrf.mxu0  ;;  %v572_v37 = vpop.eup %571 }
  0xbb   :  { %v385_v39 = vpack.c.bf16 %v572_v37, %v570_v35  ;;  %v289_v58 = vadd.f32 %v288_v36, %v101_v28  ;;  %v551_v37 = vld [vmem:[%s822_s3 + $0x4] sm:$0xf] }
  0xbd   :  { %438 = vmatpush.bf16.msra.mxu1 %v386_v38  ;;  %v535_v38 = vld [vmem:[%s822_s3 + $0x8] sm:$0xf0] }
  0xc0   :  { %v318_v41 = vpop.f32.mrf.mxu3 }
  0xc1   :  { %439 = vmatpush.bf16.msra.mxu1 %v385_v39  ;;  %v319_v48 = vadd.f32 %v318_v41, %v762_v49  ;;  %v284_v49 = vadd.f32 %v283_v16, %v770_v56  ;;  %v538_v41 = vor.u32 %v551_v37, %v535_v38 }
  0xc2   :  { %v290_v42 = vpop.f32.mrf.mxu0 }
  0xc3   :  { %v291_v54 = vadd.f32 %v290_v42, %v766_v52  ;;  %v335_v52 = vpack.c.bf16 %v316_v57, %v314_v63 }
  0xc5   :  { %v330_v5 = vpack.c.bf16 %v291_v54, %v289_v58  ;;  %v354_v18 = vunpack.c.l.bf16 %v335_v52  ;;  %v355_v56 = vunpack.c.h.bf16 %v335_v52 }
  0xc7   :  { %v344_v13 = vunpack.c.l.bf16 %v330_v5  ;;  %v345_v15 = vunpack.c.h.bf16 %v330_v5 }
  0xc8   :  { %v320_v43 = vpop.f32.mrf.mxu3 }
  0xc9   :  { %v321_v45 = vadd.f32 %v320_v43, %v166_v40 }
  0xca   :  { %v293_v46 = vpop.f32.mrf.mxu0 }
  0xcb   :  { %v336_v51 = vpack.c.bf16 %v321_v45, %v319_v48  ;;  %v294_v6 = vadd.f32 %v293_v46, %v111_v17  ;;  %v533_v48 = vld [vmem:[%s822_s3] sm:$0xf] }
  0xcd   :  { %v356_v2 = vunpack.c.l.bf16 %v336_v51  ;;  %v357_v10 = vunpack.c.h.bf16 %v336_v51  ;;  %v552_v51 = vld [vmem:[%s822_s3 + $0x4] sm:$0xf0] }
  0xce   :  { %v534_v57 = vor.u32 %v552_v51, %v533_v48 }
  0xcf   :  { %573 = vtanh.f32 %v356_v2 }
  0xd0   :  { %v323_v55 = vpop.f32.mrf.mxu3 }
  0xd1   :  { %v324_v61 = vadd.f32 %v323_v55, %v760_v47  ;;  %v329_v47 = vpack.c.bf16 %v286_v0, %v284_v49  ;;  %v393_v55 = vld [vmem:[%s822_s3 + $0x10] sm:$0xff] }
  0xd2   :  { %v295_v3 = vpop.f32.mrf.mxu0  ;;  %v420_v58 = vunpack.c.h.b16 %v393_v55  ;;  %v419_v63 = vunpack.c.l.b16 %v393_v55 }
  0xd3   :  { %v337_v7 = vpack.c.bf16 %v324_v61, %v324_v61  ;;  %v296_v8 = vadd.f32 %v295_v3, %v764_v50  ;;  %v279_v50 = vadd.f32 %v774_v60, %v772_v59  ;;  %v342_v19 = vunpack.c.l.bf16 %v329_v47  ;;  %v400_v3 = vpop.permute.xlu0 %399 }
  0xd4   :  { %v343_v20 = vunpack.c.h.bf16 %v329_v47  ;;  %v424_v61 = vpack.c.b16 %v420_v58, %v420_v58  ;;  %v423_v0 = vpack.c.b16 %v419_v63, %v419_v63 }
  0xd5   :  { %v358_v11 = vunpack.c.l.bf16 %v337_v7  ;;  %v331_v62 = vpack.c.bf16 %v296_v8, %v294_v6  ;;  %v328_v16 = vpack.c.bf16 %v281_v12, %v279_v50  ;;  %v574_v1 = vpop.eup %573  ;;  %v405_v8 = vpop.permute.xlu1 %404 }
  0xd7   :  { %575 = vtanh.f32 %v358_v11  ;;  %v346_v53 = vunpack.c.l.bf16 %v331_v62  ;;  %v347_v14 = vunpack.c.h.bf16 %v331_v62  ;;  %v340_v25 = vunpack.c.l.bf16 %v328_v16  ;;  %v410_v62 = vpop.permute.xlu2 %409 }
  0xd8   :  { %577 = vtanh.f32 %v357_v10  ;;  %v325_v17 = vpop.f32.mrf.mxu3  ;;  %v341_v59 = vunpack.c.h.bf16 %v328_v16 }
  0xd9   :  { %579 = vtanh.f32 %v346_v53 }
  0xda   :  { %581 = vtanh.f32 %v347_v14 }
  0xdb   :  { %583 = vtanh.f32 %v344_v13 }
  0xdc   :  { %585 = vtanh.f32 %v345_v15 }
  0xdd   :  { %v576_v21 = vpop.eup %575  ;;  %587 = vtanh.f32 %v354_v18 }
  0xde   :  { %v578_v22 = vpop.eup %577  ;;  %589 = vtanh.f32 %v355_v56  ;;  %v390_v23 = vpack.c.bf16 %v576_v21, %v576_v21 }
  0xdf   :  { %v580_v24 = vpop.eup %579  ;;  %591 = vtanh.f32 %v342_v19  ;;  %v389_v32 = vpack.c.bf16 %v578_v22, %v574_v1 }
  0xe0   :  { %v582_v26 = vpop.eup %581  ;;  %593 = vtanh.f32 %v343_v20  ;;  %v435_v60 = vsel %vm260_vm0, %v390_v23, 0 }
  0xe1   :  { %v584_v27 = vpop.eup %583  ;;  %460 = vmatpush.bf16.msrb.mxu2 %v435_v60  ;;  %v384_v28 = vpack.c.bf16 %v582_v26, %v580_v24  ;;  %595 = vtanh.f32 %v340_v25 }
  0xe2   :  { %v586_v29 = vpop.eup %585  ;;  %597 = vtanh.f32 %v341_v59 }
  0xe3   :  { %v588_v30 = vpop.eup %587  ;;  %440 = vmatpush.bf16.msra.mxu1 %v384_v28  ;;  %v383_v36 = vpack.c.bf16 %v586_v29, %v584_v27  ;;  %599 = vtanh.f32 %v338_v31 }
  0xe4   :  { %v590_v33 = vpop.eup %589  ;;  %601 = vtanh.f32 %v339_v34 }
  0xe5   :  { %v592_v35 = vpop.eup %591  ;;  %461 = vmatpush.bf16.msrb.mxu2 %v389_v32  ;;  %v388_v40 = vpack.c.bf16 %v590_v33, %v588_v30 }
  0xe6   :  { %v594_v39 = vpop.eup %593 }
  0xe7   :  { %441 = vmatpush.bf16.msra.mxu1 %v383_v36  ;;  %v596_v42 = vpop.eup %595  ;;  %v382_v9 = vpack.c.bf16 %v594_v39, %v592_v35 }
  0xe8   :  { %v598_v43 = vpop.eup %597 }
  0xe9   :  { %462 = vmatpush.bf16.msrb.mxu2 %v388_v40  ;;  %v600_v44 = vpop.eup %599  ;;  %v381_v45 = vpack.c.bf16 %v598_v43, %v596_v42 }
  0xea   :  { %v602_v46 = vpop.eup %601 }
  0xeb   :  { %442 = vmatpush.bf16.msra.mxu1 %v382_v9  ;;  %v380_v54 = vpack.c.bf16 %v602_v46, %v600_v44 }
  0xec   :  { %539 = vmatmul.msk.bf16.vlgmr.msrb.gmra.mxu2 %vm427_vm2, %v538_v41 }
  0xef   :  { %443 = vmatpush.bf16.msra.mxu1 %v381_v45 }
  0xf3   :  { %444 = vmatpush.bf16.msra.mxu1 %v380_v54 }
  0xf6   :  { %445 = vmatmul.bf16.vlgmr.msra.gmra.mxu1 %v534_v57 }
  0xfc   :  { %540 = vmatmul.msk.bf16.gmra.mxu2 %vm427_vm2, %v424_v61 }
 0x106   :  { %450 = vmatmul.bf16.gmra.mxu1 %v423_v0 }
 0x16f   :  { %v464_v2 = vpop.f32.mrf.mxu2 }
 0x173   :  { %v446_v4 = vpop.f32.mrf.mxu1 }
 0x174   :  { %v447_v5 = vadd.f32 %v446_v4, %v400_v3 }
 0x176   :  { %v465_v6 = vadd.f32 %v464_v2, %v447_v5 }
 0x177   :  { %v466_v7 = vpop.f32.mrf.mxu2 }
 0x178   :  { %473 = vst [vmem:[%s823_s5] sm:$0xff] %v465_v6 }
 0x17b   :  { %v448_v49 = vpop.f32.mrf.mxu1 }
 0x17c   :  { %v449_v10 = vadd.f32 %v448_v49, %v405_v8 }
 0x17e   :  { %v467_v52 = vadd.f32 %v466_v7, %v449_v10 }
 0x17f   :  { %v469_v11 = vpop.f32.mrf.mxu2 }
 0x180   :  { %474 = vst [vmem:[%s823_s5 + $0x8] sm:$0xff] %v467_v52 }
 0x183   :  { %v451_v12 = vpop.f32.mrf.mxu1 }
 0x184   :  { %v452_v47 = vadd.f32 %v451_v12, %v410_v62 }
 0x186   :  { %v470_v13 = vadd.f32 %v469_v11, %v452_v47 }
 0x187   :  { %v471_v53 = vpop.f32.mrf.mxu2 }
 0x188   :  { %475 = vst [vmem:[%s823_s5 + $0x10] sm:$0xff] %v470_v13 }
 0x18b   :  { %v453_v14 = vpop.f32.mrf.mxu1 }

</bundles_post_ra>
